<compile_context>
chip_gen: v6e
topology: v6e:2x2x1
jax: 0.10.0
libtpu: 0.0.40
codegen_flags: <defaults>
</compile_context>

<pallas_src>
import functools

import jax
import jax.numpy as jnp
from jax.experimental import pallas as pl
from jax.experimental.pallas import tpu as pltpu


def _round_up(x, m):
    return (x + m - 1) // m * m


def _pad2(a, rows, cols):
    r, c = a.shape
    if r == rows and c == cols:
        return a
    return jnp.pad(a, ((0, rows - r), (0, cols - c)))


# --------------------------------------------------------------------------
# Kernel
# --------------------------------------------------------------------------
def support_encoder_kernel(x_ref, w1_ref, b1_ref, w2_ref, b2_ref,
                           gamma_ref, beta_ref, o_ref, *, d_model, eps):
    # x_ref: (TB, Dp) pipelined batch tile; everything else is VMEM-resident.
    x = x_ref[...]

    # proj1 + relu: bf16 operands on the MXU, f32 accumulation.
    h = jnp.dot(x.astype(w1_ref.dtype), w1_ref[...],
                preferred_element_type=jnp.float32)
    h = jnp.maximum(h + b1_ref[...], 0.0)                      # [TB, Hp], f32

    # proj2 (dropout = identity in eval mode).
    y = jnp.dot(h.astype(w2_ref.dtype), w2_ref[...],
                preferred_element_type=jnp.float32)
    y = y + b2_ref[...]                                        # [TB, Dp], f32

    # residual -- padded lanes of x / y are exactly zero, so z's padded lanes
    # are zero too.
    z = y + x.astype(jnp.float32)

    if d_model > 1:
        # LayerNorm over the valid d_model lanes. Because padded lanes of z
        # are zero, plain lane sums already equal the valid-lane sums, so no
        # per-tile mask is needed (sum-of-squares variance form).
        inv_d = 1.0 / d_model
        inv_dm1 = 1.0 / (d_model - 1)
        s1 = jnp.sum(z, axis=-1, keepdims=True)
        s2 = jnp.sum(z * z, axis=-1, keepdims=True)
        mu = s1 * inv_d
        var = jnp.maximum((s2 - d_model * mu * mu) * inv_dm1, 0.0)
        sigma = jnp.sqrt(var)
        inv = pl.reciprocal(sigma + eps)        # exact; EUP reciprocal
        out = (z - mu) * inv * gamma_ref[...] + beta_ref[...]
        # padded lanes: gamma = beta = 0  ->  out padded lanes are 0
    else:
        # torch LayerNormalization short-circuit: z.size(1) == 1 -> return z.
        out = z

    o_ref[...] = out.astype(o_ref.dtype)


# --------------------------------------------------------------------------
# Parameter preparation (done ONCE, off the per-call path)
# --------------------------------------------------------------------------
def prepare_params(w1, b1, w2, b2, gamma, beta, *, compute_dtype=jnp.bfloat16):
    """Pad feature dims to 128-lane multiples and cast weights to the MXU
    compute dtype (bf16 by default). Biases / gamma / beta stay f32 so the
    kernel epilogue needs no per-step casts."""
    d_model, d_inner = w1.shape
    Dp = _round_up(d_model, 128)
    Hp = _round_up(d_inner, 128)
    return dict(
        w1=_pad2(w1, Dp, Hp).astype(compute_dtype),
        b1=_pad2(jnp.reshape(b1, (1, -1)), 1, Hp).astype(jnp.float32),
        w2=_pad2(w2, Hp, Dp).astype(compute_dtype),
        b2=_pad2(jnp.reshape(b2, (1, -1)), 1, Dp).astype(jnp.float32),
        gamma=_pad2(jnp.reshape(gamma, (1, -1)), 1, Dp).astype(jnp.float32),
        beta=_pad2(jnp.reshape(beta, (1, -1)), 1, Dp).astype(jnp.float32),
        d_model=d_model, d_inner=d_inner,
    )


# --------------------------------------------------------------------------
# Wrapper
# --------------------------------------------------------------------------
def support_encoder(x, params, *, eps=1e-3, block_b=512):
    """x: [B, d_model]. `params` comes from prepare_params (pre-padded weights
    stored transposed relative to torch.nn.Linear, so the kernel does x @ W)."""
    B, d_model = x.shape
    assert d_model == params["d_model"], "x feature dim mismatch"
    w1p, b1p, w2p = params["w1"], params["b1"], params["w2"]
    b2p, gp, bp = params["b2"], params["gamma"], params["beta"]
    Dp, Hp = w1p.shape

    # ---- generation-aware VMEM budget -> batch tile size --------------------
    try:
        vmem_cap = int(pltpu.get_tpu_info().vmem_capacity_bytes)
    except Exception:  # conservative fallback (v7x per-TC size)
        vmem_cap = 64 * 1024 * 1024
    vmem_budget = int(0.75 * vmem_cap)

    # Resident operands: the pipeliner keeps 2 revolving buffers even though
    # the index_map is constant, so budget 2x their bytes.
    resident_bytes = 2 * sum(int(a.size) * a.dtype.itemsize
                             for a in (w1p, w2p, b1p, b2p, gp, bp))
    # Per batch-row bytes: double-buffered x and out tiles plus the f32
    # intermediates (h is the big hidden consumer; y/z/epilogue ~3x Dp).
    per_row = (2 * Dp * x.dtype.itemsize          # x tile, double-buffered
               + 2 * Dp * x.dtype.itemsize        # out tile, double-buffered
               + 4 * Hp                           # h (f32)
               + 3 * 4 * Dp)                      # y / z / epilogue temps (f32)
    avail = vmem_budget - resident_bytes - (6 << 20)
    if avail <= 0:
        # TODO(synk): tile the d_inner axis ("arbitrary" grid dim + f32
        # accumulator scratch) instead of keeping both weights resident.
        raise NotImplementedError(
            "weights too large to keep resident in VMEM on this TPU; "
            "d_inner-tiled fallback not implemented")
    tb_cap = max(8, (avail // per_row) // 8 * 8)

    Bp0 = _round_up(B, 8)
    TB = min(_round_up(max(block_b, 8), 8), tb_cap, Bp0)
    # Keep >= 2 grid steps when possible so the "parallel" batch axis can
    # shard across both TensorCores on v7x (harmless on single-TC v5e/v6e).
    if Bp0 // TB < 2 and Bp0 >= 16:
        TB = max(8, _round_up((Bp0 + 1) // 2, 8))
    Bp = _round_up(B, TB)

    # Only x is padded per call (no-op when already aligned).
    if Bp == B and Dp == d_model:
        xp = x
    else:
        xp = jnp.pad(x, ((0, Bp - B), (0, Dp - d_model)))

    vmem_need = resident_bytes + per_row * TB + (4 << 20)
    vmem_limit = int(min(vmem_budget, max(vmem_need, 32 * 1024 * 1024)))

    cost = pl.CostEstimate(
        flops=2 * 2 * Bp * Dp * Hp,
        transcendentals=2 * Bp,                    # sqrt + reciprocal per row
        bytes_accessed=(int(xp.size) + Bp * Dp) * x.dtype.itemsize
        + sum(int(a.size) * a.dtype.itemsize
              for a in (w1p, w2p, b1p, b2p, gp, bp)),
    )

    kernel = functools.partial(support_encoder_kernel, d_model=d_model, eps=eps)
    resident = lambda i: (0, 0)   # weights / bias / gamma / beta stay in VMEM
    moving = lambda i: (i, 0)     # x / out tiles pipelined over the batch

    out = pl.pallas_call(
        kernel,
        out_shape=jax.ShapeDtypeStruct((Bp, Dp), x.dtype),
        grid=(Bp // TB,),
        in_specs=[
            pl.BlockSpec((TB, Dp), moving),     # x
            pl.BlockSpec((Dp, Hp), resident),   # w1
            pl.BlockSpec((1, Hp), resident),    # b1
            pl.BlockSpec((Hp, Dp), resident),   # w2
            pl.BlockSpec((1, Dp), resident),    # b2
            pl.BlockSpec((1, Dp), resident),    # gamma
            pl.BlockSpec((1, Dp), resident),    # beta
        ],
        out_specs=pl.BlockSpec((TB, Dp), moving),
        compiler_params=pltpu.CompilerParams(
            dimension_semantics=("parallel",),
            vmem_limit_bytes=vmem_limit,
        ),
        cost_estimate=cost,
    )(xp, w1p, b1p, w2p, b2p, gp, bp)

    return out[:B, :d_model]


# --------------------------------------------------------------------------
# Parameter init (mirrors the torch module) + reference
# --------------------------------------------------------------------------
def init_params(key, d_model, d_inner):
    k1, k2, k3, k4 = jax.random.split(key, 4)
    std = (2.0 / (d_model + d_inner)) ** 0.5      # xavier_normal_
    # Stored transposed vs. torch.nn.Linear so the kernel does x @ W.
    w1 = std * jax.random.normal(k1, (d_model, d_inner), jnp.float32)
    w2 = std * jax.random.normal(k2, (d_inner, d_model), jnp.float32)
    b1 = jax.random.uniform(k3, (d_inner,), jnp.float32,
                            -1.0 / d_model ** 0.5, 1.0 / d_model ** 0.5)
    b2 = jax.random.uniform(k4, (d_model,), jnp.float32,
                            -1.0 / d_inner ** 0.5, 1.0 / d_inner ** 0.5)
    gamma = jnp.ones((d_model,), jnp.float32)     # a_2
    beta = jnp.zeros((d_model,), jnp.float32)     # b_2
    return w1, b1, w2, b2, gamma, beta


def reference(x, params, eps=1e-3):
    """Pure-JAX reference mirroring the kernel's dtype handling (bf16 matmul
    operands, f32 accumulation / residual / LayerNorm epilogue)."""
    d_model, d_inner = params["d_model"], params["d_inner"]
    cd = params["w1"].dtype
    w1 = params["w1"][:d_model, :d_inner].astype(jnp.float32)
    b1 = params["b1"][:, :d_inner]
    w2 = params["w2"][:d_inner, :d_model].astype(jnp.float32)
    b2 = params["b2"][:, :d_model]
    gamma = params["gamma"][:, :d_model]
    beta = params["beta"][:, :d_model]

    xw = x.astype(cd).astype(jnp.float32)
    h = jnp.maximum(jnp.dot(xw, w1, precision="highest") + b1, 0.0)
    y = jnp.dot(h.astype(cd).astype(jnp.float32), w2, precision="highest") + b2
    z = y + x
    if d_model == 1:
        return z
    mu = jnp.mean(z, axis=-1, keepdims=True)
    sigma = jnp.sqrt(jnp.sum((z - mu) ** 2, axis=-1, keepdims=True)
                     / (d_model - 1))
    return (z - mu) / (sigma + eps) * gamma + beta


if __name__ == "__main__":
    key = jax.random.PRNGKey(0)
    d_model, d_inner, batch = 32, 64, 300    # batch chosen to exercise the grid
    kx, kp = jax.random.split(key)
    x = jax.random.normal(kx, (batch, d_model), jnp.float32)
    raw = init_params(kp, d_model, d_inner)
    params = prepare_params(*raw, compute_dtype=jnp.bfloat16)

    # block_b=128 -> multiple pipelined grid steps over the (padded) batch.
    out = support_encoder(x, params, block_b=128)
    out = jax.block_until_ready(out)

    ref = reference(x, params)
    assert out.shape == (batch, d_model)
    err = float(jnp.max(jnp.abs(out - ref)))
    assert jnp.allclose(out, ref, atol=1e-4, rtol=1e-4), err
    print("KERNEL_OK")
</pallas_src>

<mosaic_0001>
module attributes {stable_mosaic.version = 11 : i64} {
  func.func @support_encoder_kernel(%arg0: i32, %arg1: memref<128x128xf32, #tpu.memory_space<vmem>>, %arg2: memref<128x128xbf16, #tpu.memory_space<vmem>>, %arg3: memref<1x128xf32, #tpu.memory_space<vmem>>, %arg4: memref<128x128xbf16, #tpu.memory_space<vmem>>, %arg5: memref<1x128xf32, #tpu.memory_space<vmem>>, %arg6: memref<1x128xf32, #tpu.memory_space<vmem>>, %arg7: memref<1x128xf32, #tpu.memory_space<vmem>>, %arg8: memref<128x128xf32, #tpu.memory_space<vmem>>) attributes {dimension_semantics = [#tpu.dimension_semantics<parallel>], iteration_bounds = array<i64: 3>, scalar_prefetch = 0 : i64, scratch_operands = 0 : i64, tpu.core_type = #tpu.core_type<tc>, window_params = [{transform_indices = @transform_0, window_bounds = array<i64: 128, 128>}, {pipeline_mode = #tpu.pipeline_mode<synchronous>, transform_indices = @transform_1, window_bounds = array<i64: 128, 128>}, {pipeline_mode = #tpu.pipeline_mode<synchronous>, transform_indices = @transform_2, window_bounds = array<i64: 1, 128>}, {pipeline_mode = #tpu.pipeline_mode<synchronous>, transform_indices = @transform_3, window_bounds = array<i64: 128, 128>}, {pipeline_mode = #tpu.pipeline_mode<synchronous>, transform_indices = @transform_4, window_bounds = array<i64: 1, 128>}, {pipeline_mode = #tpu.pipeline_mode<synchronous>, transform_indices = @transform_5, window_bounds = array<i64: 1, 128>}, {pipeline_mode = #tpu.pipeline_mode<synchronous>, transform_indices = @transform_6, window_bounds = array<i64: 1, 128>}, {transform_indices = @transform_7, window_bounds = array<i64: 128, 128>}]} {
    %c0 = arith.constant 0 : index
    %c0_0 = arith.constant 0 : index
    %0 = vector.load %arg1[%c0, %c0_0] : memref<128x128xf32, #tpu.memory_space<vmem>>, vector<128x128xf32>
    %1 = arith.truncf %0 : vector<128x128xf32> to vector<128x128xbf16>
    %c0_1 = arith.constant 0 : index
    %c0_2 = arith.constant 0 : index
    %2 = vector.load %arg2[%c0_1, %c0_2] : memref<128x128xbf16, #tpu.memory_space<vmem>>, vector<128x128xbf16>
    %cst = arith.constant dense<0.000000e+00> : vector<128x128xf32>
    %3 = tpu.matmul %1, %2, %cst {dimension_numbers = #tpu.dot_dimension_numbers<[1], [0], [0], [1], [0, 0, 1, 1], [], []>} : vector<128x128xbf16>, vector<128x128xbf16>, vector<128x128xf32> -> vector<128x128xf32>
    %c0_3 = arith.constant 0 : index
    %c0_4 = arith.constant 0 : index
    %4 = vector.load %arg3[%c0_3, %c0_4] : memref<1x128xf32, #tpu.memory_space<vmem>>, vector<1x128xf32>
    %5 = vector.broadcast %4 : vector<1x128xf32> to vector<128x128xf32>
    %6 = arith.addf %3, %5 : vector<128x128xf32>
    %cst_5 = arith.constant 0.000000e+00 : f32
    %7 = vector.broadcast %cst_5 : f32 to vector<128x128xf32>
    %8 = arith.maximumf %6, %7 : vector<128x128xf32>
    %9 = arith.truncf %8 : vector<128x128xf32> to vector<128x128xbf16>
    %c0_6 = arith.constant 0 : index
    %c0_7 = arith.constant 0 : index
    %10 = vector.load %arg4[%c0_6, %c0_7] : memref<128x128xbf16, #tpu.memory_space<vmem>>, vector<128x128xbf16>
    %cst_8 = arith.constant dense<0.000000e+00> : vector<128x128xf32>
    %11 = tpu.matmul %9, %10, %cst_8 {dimension_numbers = #tpu.dot_dimension_numbers<[1], [0], [0], [1], [0, 0, 1, 1], [], []>} : vector<128x128xbf16>, vector<128x128xbf16>, vector<128x128xf32> -> vector<128x128xf32>
    %c0_9 = arith.constant 0 : index
    %c0_10 = arith.constant 0 : index
    %12 = vector.load %arg5[%c0_9, %c0_10] : memref<1x128xf32, #tpu.memory_space<vmem>>, vector<1x128xf32>
    %13 = vector.broadcast %12 : vector<1x128xf32> to vector<128x128xf32>
    %14 = arith.addf %11, %13 : vector<128x128xf32>
    %15 = arith.addf %14, %0 : vector<128x128xf32>
    %cst_11 = arith.constant dense<0.000000e+00> : vector<128xf32>
    %16 = vector.multi_reduction <add>, %15, %cst_11 [1] : vector<128x128xf32> to vector<128xf32>
    %17 = vector.shape_cast %16 : vector<128xf32> to vector<128x1xf32>
    %18 = arith.mulf %15, %15 : vector<128x128xf32>
    %cst_12 = arith.constant dense<0.000000e+00> : vector<128xf32>
    %19 = vector.multi_reduction <add>, %18, %cst_12 [1] : vector<128x128xf32> to vector<128xf32>
    %20 = vector.shape_cast %19 : vector<128xf32> to vector<128x1xf32>
    %cst_13 = arith.constant 3.125000e-02 : f32
    %21 = vector.broadcast %cst_13 : f32 to vector<128x1xf32>
    %22 = arith.mulf %17, %21 : vector<128x1xf32>
    %cst_14 = arith.constant 3.200000e+01 : f32
    %23 = vector.broadcast %cst_14 : f32 to vector<128x1xf32>
    %24 = arith.mulf %23, %22 : vector<128x1xf32>
    %25 = arith.mulf %24, %22 : vector<128x1xf32>
    %26 = arith.subf %20, %25 : vector<128x1xf32>
    %cst_15 = arith.constant 0.0322580636 : f32
    %27 = vector.broadcast %cst_15 : f32 to vector<128x1xf32>
    %28 = arith.mulf %26, %27 : vector<128x1xf32>
    %cst_16 = arith.constant 0.000000e+00 : f32
    %29 = vector.broadcast %cst_16 : f32 to vector<128x1xf32>
    %30 = arith.maximumf %28, %29 : vector<128x1xf32>
    %31 = math.sqrt %30 : vector<128x1xf32>
    %cst_17 = arith.constant 1.000000e-03 : f32
    %32 = vector.broadcast %cst_17 : f32 to vector<128x1xf32>
    %33 = arith.addf %31, %32 : vector<128x1xf32>
    %34 = tpu.reciprocal %33 : vector<128x1xf32> -> vector<128x1xf32>
    %35 = vector.broadcast %22 : vector<128x1xf32> to vector<128x128xf32>
    %36 = arith.subf %15, %35 : vector<128x128xf32>
    %37 = vector.broadcast %34 : vector<128x1xf32> to vector<128x128xf32>
    %38 = arith.mulf %36, %37 : vector<128x128xf32>
    %c0_18 = arith.constant 0 : index
    %c0_19 = arith.constant 0 : index
    %39 = vector.load %arg6[%c0_18, %c0_19] : memref<1x128xf32, #tpu.memory_space<vmem>>, vector<1x128xf32>
    %40 = vector.broadcast %39 : vector<1x128xf32> to vector<128x128xf32>
    %41 = arith.mulf %38, %40 : vector<128x128xf32>
    %c0_20 = arith.constant 0 : index
    %c0_21 = arith.constant 0 : index
    %42 = vector.load %arg7[%c0_20, %c0_21] : memref<1x128xf32, #tpu.memory_space<vmem>>, vector<1x128xf32>
    %43 = vector.broadcast %42 : vector<1x128xf32> to vector<128x128xf32>
    %44 = arith.addf %41, %43 : vector<128x128xf32>
    %c0_22 = arith.constant 0 : index
    %c0_23 = arith.constant 0 : index
    %45 = vector.load %arg8[%c0_22, %c0_23] : memref<128x128xf32, #tpu.memory_space<vmem>>, vector<128x128xf32>
    tpu.vector_store %arg8[%c0_22, %c0_23], %44 {strides = array<i32>} : memref<128x128xf32, #tpu.memory_space<vmem>>, vector<128x128xf32>,
    return
  }
  func.func @transform_0(%arg0: i32) -> (i32, i32) {
    %c0_i32 = arith.constant 0 : i32
    %c0_i32_0 = arith.constant 0 : i32
    return %arg0, %c0_i32 : i32, i32
  }
  func.func @transform_1(%arg0: i32) -> (i32, i32) {
    %c0_i32 = arith.constant 0 : i32
    %c0_i32_0 = arith.constant 0 : i32
    %c0_i32_1 = arith.constant 0 : i32
    return %c0_i32, %c0_i32_0 : i32, i32
  }
  func.func @transform_2(%arg0: i32) -> (i32, i32) {
    %c0_i32 = arith.constant 0 : i32
    %c0_i32_0 = arith.constant 0 : i32
    %c0_i32_1 = arith.constant 0 : i32
    return %c0_i32, %c0_i32_0 : i32, i32
  }
  func.func @transform_3(%arg0: i32) -> (i32, i32) {
    %c0_i32 = arith.constant 0 : i32
    %c0_i32_0 = arith.constant 0 : i32
    %c0_i32_1 = arith.constant 0 : i32
    return %c0_i32, %c0_i32_0 : i32, i32
  }
  func.func @transform_4(%arg0: i32) -> (i32, i32) {
    %c0_i32 = arith.constant 0 : i32
    %c0_i32_0 = arith.constant 0 : i32
    %c0_i32_1 = arith.constant 0 : i32
    return %c0_i32, %c0_i32_0 : i32, i32
  }
  func.func @transform_5(%arg0: i32) -> (i32, i32) {
    %c0_i32 = arith.constant 0 : i32
    %c0_i32_0 = arith.constant 0 : i32
    %c0_i32_1 = arith.constant 0 : i32
    return %c0_i32, %c0_i32_0 : i32, i32
  }
  func.func @transform_6(%arg0: i32) -> (i32, i32) {
    %c0_i32 = arith.constant 0 : i32
    %c0_i32_0 = arith.constant 0 : i32
    %c0_i32_1 = arith.constant 0 : i32
    return %c0_i32, %c0_i32_0 : i32, i32
  }
  func.func @transform_7(%arg0: i32) -> (i32, i32) {
    %c0_i32 = arith.constant 0 : i32
    %c0_i32_0 = arith.constant 0 : i32
    return %arg0, %c0_i32 : i32, i32
  }
}

</mosaic_0001>

<bundles_post_ra>
// kernel: tpu_custom_call.1
= control target key start
LH: loop header
LB: loop body
LE: loop exit
PB: predicated region body
PF: predicated region fallthrough
CT: control target
= control target key end

     0   :  { %s2404_s0 = inlined_call_operand.hbm [shape: f32[384,128], index: 0, kind: input, shape index: {}]   ;;  %s2405_s1 = inlined_call_operand.hbm [shape: bf16[128,128], index: 1, kind: input, shape index: {}]   ;;  %s2406_s2 = inlined_call_operand.vmem [shape: f32[1,128], index: 2, kind: input, shape index: {}]   ;;  %s2407_s3 = inlined_call_operand.hbm [shape: bf16[128,128], index: 3, kind: input, shape index: {}]   ;;  %s2408_s4 = inlined_call_operand.vmem [shape: f32[1,128], index: 4, kind: input, shape index: {}]   ;;  %s2409_s5 = inlined_call_operand.vmem [shape: f32[1,128], index: 5, kind: input, shape index: {}]   ;;  %s2410_s6 = inlined_call_operand.vmem [shape: f32[1,128], index: 6, kind: input, shape index: {}]   ;;  %s2411_s7 = inlined_call_operand.hbm [shape: f32[384,128], index: 7, kind: output, shape index: {}]  }
   0x1   :  { %2416 = sst [smem:[#allocation12_spill]] %s2405_s1 }
   0x2   :  { %12 = vsyncpa [#allocation3], 0 }
   0x3   :  { %14 = vsyncpa [#allocation3 + $0x1], 0 }
   0x4   :  { %15 = vsyncpa [#allocation6], 0 }
   0x5   :  { %16 = vsyncpa [#allocation4], 0 }
   0x6   :  { %18 = vsyncpa [#allocation4 + $0x1], 0  ;;  %s1738_s24 = smov 0   ;;  %s1740_s25 = smov 0  }
   0x7   :  { %s1742_s26 = smov 0   ;;  %s1744_s27 = smov 0  }
   0x8 LB: > { %s1759_s28 = sadd.s32 4294967295, %s1686_s27   ;;  %s1249_s29 = sadd.s32 4294967294, %s1686_s27   ;;  %s1686_s27 = sphi %s1744_s27, %s2434_s27   ;;  %s1682_s26 = sphi %s1742_s26, %s2433_s26   ;;  %s1678_s25 = sphi %s1740_s25, %s2432_s25   ;;  %s1674_s24 = sphi %s1738_s24, %s2431_s24  }
   0x9   : > { %p44_p0 = scmp.ne.s32.totalorder %s1678_s25, %s1674_s24  ;;  %p2412_p1 = scmp.eq.s32.totalorder %s1759_s28, 0 }
   0xa   : > { %p200_p3 = scmp.eq.s32.totalorder %s1249_s29, 2  ;;  %p1250_p5 = scmp.ge.s32.totalorder %s1686_s27, 1 }
   0xb   : > { %p1768_p4 = por %p2412_p1, %p44_p0  ;;  %p207_p7 = scmp.lt.s32.totalorder %s1686_s27, 4 }
   0xc   : > { %p1773_p6 = por %p200_p3, %p44_p0  ;;  %s1688_s10 = smov [#allocation5]  }
   0xd   : > { %s2417_s30 = scalar_select %p1768_p4, 1, 0 }
   0xe   : > { %s2418_s8 = scalar_select %p1773_p6, 1, 0 }
   0xf   : > { %p1778_p8 = pnand %p1250_p5, %p207_p7  ;;  %s219_s11 = sshll.u32 %s1688_s10, 4  ;;  %s220_s11 = int_to_ptr.vmem [resolvable:$true] %s219_s11 }
  0x10   : > { %s1689_s13 = smov [#allocation7]   ;;  %s1549_s15 = scalar_lea.vmem %s220_s11, 1024 }
  0x11   : > { %s2419_s9 = scalar_select %p1778_p8, 1, 0 }
  0x12   : > { %p1397_p9 = pneg %p1778_p8  ;;  %s235_s14 = sshll.u32 %s1689_s13, 4  ;;  %s236_s14 = int_to_ptr.vmem [resolvable:$true] %s235_s14 }
  0x13   : > { %p1550_p12 = scmp.ne.s32.totalorder %s220_s11, %s1549_s15  ;;  %p1557_p3 = scmp.lt.s32.totalorder %s220_s11, %s220_s11 }
  0x14   : > { %p1786_p10 = pnand %p1397_p9, %p2412_p1  ;;  %p1558_p5 = scmp.lt.s32.totalorder %s1549_s15, %s1549_s15 }
  0x16   : > { %p1540_p11 = pneg %p1786_p10  ;;  %p1559_p7 = por %p1558_p5, %p1557_p3 }
  0x18   : > { %p1552_p13 = pnand %p1550_p12, %p1540_p11 }
  0x1a   : > { %p1553_p0 = pneg %p1552_p13 }
  0x1c   : > { %p1560_p9 = pnand %p1559_p7, %p1553_p0 }
  0x1e   : > { %1563 = shalt.err (!%p1560_p9)
}
  0x1f   : > { %s1690_s16 = smov 64   ;;  %s1691_s17 = smov 4  }
  0x20   : > { %s2421_s1 = sld [smem:[#allocation12_spill]]  ;;  %s1575_s20 = scalar_lea.vmem %s236_s14, 1024 }
  0x21   : > { %p1576_p1 = scmp.ne.s32.totalorder %s236_s14, %s1575_s20  ;;  %p1583_p2 = scmp.lt.s32.totalorder %s236_s14, %s236_s14 }
  0x22   : > { %p1584_p6 = scmp.lt.s32.totalorder %s1575_s20, %s1575_s20 }
  0x23   : > { %p1578_p12 = pnand %p1576_p1, %p1540_p11 }
  0x24   : > { %p1585_p3 = por %p1584_p6, %p1583_p2 }
  0x25   : > { %p1579_p13 = pneg %p1578_p12 }
  0x26   : > { %1400 = dma.hbm_to_vmem [thread:$0]  (!%p1786_p10), %s2421_s1, 1024, %s220_s11, [#allocation6], %s1690_s16, %s1690_s16, %s1691_s17  }
  0x27   : > { %p1586_p0 = pnand %p1585_p3, %p1579_p13 }
  0x29   : > { %1589 = shalt.err (!%p1586_p0)
}
  0x2a   : > { %1403 = dma.hbm_to_vmem [thread:$0]  (!%p1786_p10), %s2407_s3, 1024, %s236_s14, [#allocation6], %s1690_s16, %s1690_s16, %s1691_s17  }
  0x2b   : > { %s1809_s23 = sadd.s32 1, %s1686_s27   ;;  %s31_s29 = sadd.s32 1, %s1682_s26 }
  0x2c   : > { %s28_s10 = ssub.s32 %s1686_s27, %s1809_s23  ;;  %p38_p1 = scmp.ne.s32.totalorder %s1682_s26, %s1678_s25 }
  0x2d   : > { %p29_p2 = scmp.eq.s32.totalorder %s28_s10, 0  ;;  %p39_p6 = scmp.eq.s32.totalorder %s1686_s27, 0 }
  0x2e   : > { %p2422_p11 = scmp.eq.s32.totalorder %s1759_s28, 2  ;;  %p1414_p7 = scmp.lt.s32.totalorder %s1686_s27, 3 }
  0x2f   : > { %s1825_s12 = scalar_select %p29_p2, %s1682_s26, %s31_s29  }
  0x30   : > { %p1819_p5 = por %p2422_p11, %p38_p1  ;;  %p40_p9 = por %p39_p6, %p38_p1 }
  0x31   : > { %s258_s13 = sand.u32 1, %s1682_s26   ;;  %s1287_s14 = sshll.u32 %s1686_s27, 11 }
  0x32   : > { %s2423_s11 = scalar_select %p1819_p5, 1, 0 }
  0x33   : > { %s1254_s15 = sshll.u32 %s258_s13, 7  ;;  %s1832_s18 = scalar_lea.hbm %s2404_s0, %s1287_s14 }
  0x34   : > { %s262_s19 = scalar_lea.vmem [#allocation2], %s1254_s15  ;;  %p1836_p10 = pnand %p1414_p7, %p40_p9 }
  0x35   : > { %s269_s20 = sshll.u32 %s262_s19, 4  ;;  %s1840_s22 = scalar_lea.sflag [#allocation3], %s258_s13  ;;  %s1834_s20 = int_to_ptr.vmem [resolvable:$true] %s269_s20 }
  0x36   : > { %s1590_s29 = scalar_lea.hbm %s1832_s18, 2048  ;;  %p1592_p13 = pneg %p1836_p10 }
  0x37   : > { %p1591_p12 = scmp.ne.s32.totalorder %s1832_s18, %s1590_s29  ;;  %s1595_s15 = scalar_lea.hbm %s2404_s0, 6144 }
  0x38   : > { %p1596_p1 = scmp.lt.s32.totalorder %s1832_s18, %s2404_s0  ;;  %p1597_p2 = scmp.lt.s32.totalorder %s1595_s15, %s1590_s29 }
  0x39   : > { %p1593_p3 = pnand %p1592_p13, %p1591_p12 }
  0x3a   : > { %p1598_p6 = por %p1597_p2, %p1596_p1 }
  0x3b   : > { %p1594_p0 = pneg %p1593_p3 }
  0x3d   : > { %p1599_p11 = pnand %p1598_p6, %p1594_p0 }
  0x3f   : > { %1602 = shalt.err (!%p1599_p11)
}
  0x40   : > { %s1603_s13 = scalar_lea.vmem %s1834_s20, 2048  ;;  %s1692_s19 = smov [#allocation2]  }
  0x41   : > { %p1604_p7 = scmp.ne.s32.totalorder %s1834_s20, %s1603_s13  ;;  %s1608_s1 = sshll.u32 %s1692_s19, 4  ;;  %s1609_s1 = int_to_ptr.vmem [resolvable:$false] %s1608_s1 }
  0x42   : > { %s1610_s10 = scalar_lea.vmem %s1609_s1, 4096  ;;  %p1611_p3 = scmp.lt.s32.totalorder %s1834_s20, %s1609_s1 }
  0x43   : > { %p1606_p9 = pnand %p1604_p7, %p1592_p13  ;;  %p1612_p5 = scmp.lt.s32.totalorder %s1610_s10, %s1603_s13 }
  0x45   : > { %p1607_p12 = pneg %p1606_p9  ;;  %p1613_p4 = por %p1612_p5, %p1611_p3 }
  0x47   : > { %p1614_p8 = pnand %p1613_p4, %p1607_p12 }
  0x49   : > { %1617 = shalt.err (!%p1614_p8)
}
  0x4a   : > { %s1693_s29 = smov 128   ;;  %s1694_s14 = smov 8  }
  0x4b   : > { %1407 = dma.hbm_to_vmem [thread:$0]  (!%p1836_p10), %s1832_s18, 2048, %s1834_s20, %s1840_s22, %s1693_s29, %s1693_s29, %s1694_s14  }
  0x4c   : > { %p2425_p13 = scmp.ne.s32.totalorder %s2419_s9, 0 }
  0x4d   : > { %s1864_s15 = sand.u32 (!%p2425_p13), 1, %s1678_s25   ;;  %p2426_p4 = scmp.ne.s32.totalorder (!%p2425_p13), %s2417_s30, 0 }
  0x4e   : > { %281 = sbr.rel (%p2425_p13) target bundleno = 795 (0x31b), region = 48  ;;  %s1258_s1 = sshll.u32 (!%p2425_p13), %s1864_s15, 7 }
  0x4f   : > { %s284_s16 = scalar_lea.sflag (!%p2425_p13), [#allocation3], %s1864_s15  ;;  %s1870_s17 = scalar_lea.vmem (!%p2425_p13), [#allocation2], %s1258_s1 }
  0x53   : > { %1661 = dma.done.wait (%p2426_p4), %s284_s16, 2048  }
  0x54   : > { %1663 = vsyncadd (%p2426_p4), %s284_s16, 4294965248  ;;  %p2427_p8 = scmp.eq.s32.totalorder %s1759_s28, 0 }
  0x56   : > { %1665 = dma.done.wait (%p2427_p8), [#allocation6], 2048   ;;  %p2428_p5 = pmov %p2427_p8 }
  0x57   : > { %v1458_v0 = vld [vmem:[#allocation5 + $0x38] sm:$0xff]   ;;  %v1459_v1 = vld [vmem:[#allocation5 + $0x30] sm:$0xff]   ;;  %v1460_v2 = vld [vmem:[#allocation5 + $0x28] sm:$0xff]   ;;  %s2202_s10 = scalar_lea.vmem [#allocation8], %s1258_s1  ;;  %s1288_s29 = sshll.u32 %s1759_s28, 11 }
  0x58   : > { %1667 = vsyncadd (%p2428_p5), [#allocation6], 4294965248  ;;  %1321 = vmatprep.subr.bf16.mxu0 %v1458_v0  ;;  %v1461_v3 = vld [vmem:[#allocation5 + $0x20] sm:$0xff]   ;;  %v1884_v5 = vld [vmem:[%s1870_s17 + $0x8] sm:$0xff]  ;;  %s1157_s14 = sshll.u32 %s2202_s10, 4  ;;  %s1144_s30 = scalar_lea.sflag [#allocation4], %s1864_s15  ;;  %s2360_s14 = int_to_ptr.vmem [resolvable:$true] %s1157_s14 }
  0x59   : > { %1322 = vmatpush3.bf16.msra.mxu0 %v1458_v0  ;;  %v1881_v4 = vld [vmem:[%s1870_s17] sm:$0xff]  ;;  %v1462_v7 = vld [vmem:[#allocation5 + $0x18] sm:$0xff]   ;;  %v1467_v9 = vld [vmem:[#allocation7 + $0x30] sm:$0xff]   ;;  %s1618_s9 = scalar_lea.vmem %s2360_s14, 2048  ;;  %p2429_p0 = scmp.ne.s32.totalorder %s2423_s11, 0 }
  0x5a   : > { %1323 = vmatprep.subr.bf16.mxu0 %v1459_v1  ;;  %v345_v6 = vpack.c.bf16 %v1884_v5, %v1881_v4  ;;  %v1466_v8 = vld [vmem:[#allocation7 + $0x38] sm:$0xff]   ;;  %v1463_v10 = vld [vmem:[#allocation5 + $0x10] sm:$0xff]   ;;  %v1468_v11 = vld [vmem:[#allocation7 + $0x28] sm:$0xff]   ;;  %p1619_p10 = scmp.ne.s32.totalorder %s2360_s14, %s1618_s9  ;;  %s1695_s28 = smov [#allocation8]  }
  0x5b   : > { %1353 = vmatprep.subr.bf16.mxu1 %v1466_v8  ;;  %v1464_v12 = vld [vmem:[#allocation5 + $0x8] sm:$0xff]   ;;  %v1469_v13 = vld [vmem:[#allocation7 + $0x20] sm:$0xff]   ;;  %v1470_v15 = vld [vmem:[#allocation7 + $0x18] sm:$0xff]   ;;  %s1622_s18 = sshll.u32 %s1695_s28, 4  ;;  %s1623_s18 = int_to_ptr.vmem [resolvable:$false] %s1622_s18 }
  0x5c   : > { %1337 = vmatprep.mubr.bf16.mxu0 %v345_v6  ;;  %1354 = vmatpush3.bf16.msra.mxu1 %v1466_v8  ;;  %v1465_v14 = vld [vmem:[#allocation5] sm:$0xff]   ;;  %v1889_v16 = vld [vmem:[%s1870_s17 + $0x10] sm:$0xff]  ;;  %v1892_v17 = vld [vmem:[%s1870_s17 + $0x18] sm:$0xff]  ;;  %p1620_p1 = pnand %p1619_p10, %p2429_p0  ;;  %s1624_s20 = scalar_lea.vmem %s1623_s18, 4096 }
  0x5d   : > { %1324 = vmatpush3.bf16.msra.mxu0 %v1459_v1  ;;  %1355 = vmatprep.subr.bf16.mxu1 %v1467_v9  ;;  %v1895_v18 = vld [vmem:[%s1870_s17 + $0x20] sm:$0xff]  ;;  %v1898_v19 = vld [vmem:[%s1870_s17 + $0x28] sm:$0xff]  ;;  %v346_v20 = vpack.c.bf16 %v1892_v17, %v1889_v16  ;;  %v1905_v22 = vld [vmem:[%s1870_s17 + $0x30] sm:$0xff]  ;;  %p1625_p6 = scmp.lt.s32.totalorder %s2360_s14, %s1623_s18  ;;  %p1626_p11 = scmp.lt.s32.totalorder %s1624_s20, %s1618_s9 }
  0x5e   : > { %1325 = vmatprep.subr.bf16.mxu0 %v1460_v2  ;;  %v347_v21 = vpack.c.bf16 %v1898_v19, %v1895_v18  ;;  %v1908_v23 = vld [vmem:[%s1870_s17 + $0x38] sm:$0xff]  ;;  %v1911_v24 = vld [vmem:[%s1870_s17 + $0x40] sm:$0xff]  ;;  %v1914_v25 = vld [vmem:[%s1870_s17 + $0x48] sm:$0xff]  ;;  %p1621_p2 = pneg %p1620_p1 }
  0x5f   : > { %v348_v26 = vpack.c.bf16 %v1908_v23, %v1905_v22  ;;  %v349_v27 = vpack.c.bf16 %v1914_v25, %v1911_v24  ;;  %v1921_v28 = vld [vmem:[%s1870_s17 + $0x50] sm:$0xff]  ;;  %v1924_v29 = vld [vmem:[%s1870_s17 + $0x58] sm:$0xff]  ;;  %v1927_v30 = vld [vmem:[%s1870_s17 + $0x60] sm:$0xff]  ;;  %p1627_p7 = por %p1626_p11, %p1625_p6 }
  0x60   : > { %1356 = vmatpush3.bf16.msra.mxu1 %v1467_v9  ;;  %v1930_v31 = vld [vmem:[%s1870_s17 + $0x68] sm:$0xff]  ;;  %v350_v32 = vpack.c.bf16 %v1924_v29, %v1921_v28  ;;  %v1937_v34 = vld [vmem:[%s1870_s17 + $0x70] sm:$0xff]  ;;  %v1940_v35 = vld [vmem:[%s1870_s17 + $0x78] sm:$0xff]  ;;  %s2358_s17 = scalar_lea.hbm %s2411_s7, %s1288_s29 }
  0x61   : > { %1326 = vmatpush3.bf16.msra.mxu0 %v1460_v2  ;;  %1357 = vmatprep.subr.bf16.mxu1 %v1468_v11  ;;  %v351_v33 = vpack.c.bf16 %v1930_v31, %v1927_v30  ;;  %v352_v36 = vpack.c.bf16 %v1940_v35, %v1937_v34  ;;  %v1471_v37 = vld [vmem:[#allocation7 + $0x10] sm:$0xff]   ;;  %v1472_v38 = vld [vmem:[#allocation7 + $0x8] sm:$0xff]   ;;  %v1473_v39 = vld [vmem:[#allocation7] sm:$0xff]   ;;  %p1628_p9 = pnand %p1627_p7, %p1621_p2 }
  0x62   : > { %1327 = vmatprep.subr.bf16.mxu0 %v1461_v3  ;;  %v1262_v42 = vld [vmem:[%s2406_s2] ss:$0 sm:$0xff] }
  0x64   : > { %1358 = vmatpush3.bf16.msra.mxu1 %v1468_v11 }
  0x65   : > { %1328 = vmatpush3.bf16.msra.mxu0 %v1461_v3  ;;  %1359 = vmatprep.subr.bf16.mxu1 %v1469_v13 }
  0x66   : > { %1329 = vmatprep.subr.bf16.mxu0 %v1462_v7 }
  0x68   : > { %1360 = vmatpush3.bf16.msra.mxu1 %v1469_v13 }
  0x69   : > { %1330 = vmatpush3.bf16.msra.mxu0 %v1462_v7  ;;  %1361 = vmatprep.subr.bf16.mxu1 %v1470_v15 }
  0x6a   : > { %1331 = vmatprep.subr.bf16.mxu0 %v1463_v10 }
  0x6c   : > { %1362 = vmatpush3.bf16.msra.mxu1 %v1470_v15 }
  0x6d   : > { %1332 = vmatpush3.bf16.msra.mxu0 %v1463_v10  ;;  %1363 = vmatprep.subr.bf16.mxu1 %v1471_v37 }
  0x6e   : > { %1333 = vmatprep.subr.bf16.mxu0 %v1464_v12 }
  0x70   : > { %1364 = vmatpush3.bf16.msra.mxu1 %v1471_v37 }
  0x71   : > { %1334 = vmatpush3.bf16.msra.mxu0 %v1464_v12  ;;  %1365 = vmatprep.subr.bf16.mxu1 %v1472_v38 }
  0x72   : > { %1335 = vmatprep.subr.bf16.mxu0 %v1465_v14 }
  0x74   : > { %1366 = vmatpush3.bf16.msra.mxu1 %v1472_v38 }
  0x75   : > { %1336 = vmatpush3.bf16.msra.mxu0 %v1465_v14  ;;  %1367 = vmatprep.subr.bf16.mxu1 %v1473_v39 }
  0x78   : > { %1338 = vmatmul.mubr.bf16.vlgmr.msra.gmra.mxu0 %v346_v20  ;;  %1368 = vmatpush3.bf16.msra.mxu1 %v1473_v39 }
  0x79   : > { %1341 = vmatprep.mubr.bf16.mxu0 %v347_v21 }
  0x80   : > { %1342 = vmatmul.mubr.bf16.gmra.mxu0 %v348_v26 }
  0x81   : > { %1345 = vmatprep.mubr.bf16.mxu0 %v349_v27 }
  0x88   : > { %1346 = vmatmul.mubr.bf16.gmra.mxu0 %v350_v32 }
  0x89   : > { %1349 = vmatprep.mubr.bf16.mxu0 %v351_v33 }
  0x90   : > { %1350 = vmatmul.mubr.bf16.gmra.mxu0 %v352_v36 }
 0x138   : > { %v1339_v40 = vpop.f32.mrf.mxu0 }
 0x139   : > { %v467_v46 = vadd.f32 %v1339_v40, %v1262_v42 }
 0x13a   : > { %v458_v41 = vpop.f32.mrf.mxu0 }
 0x13b   : > { %v459_v44 = vadd.f32 %v1262_v42, %v458_v41  ;;  %v523_v53 = vmax.f32 %v467_v46, 0.0 }
 0x13c   : > { %v1340_v43 = vpop.f32.mrf.mxu0 }
 0x13d   : > { %v470_v45 = vadd.f32 %v1340_v43, %v1262_v42  ;;  %v521_v51 = vmax.f32 %v459_v44, 0.0 }
 0x13e   : > { %v461_v47 = vpop.f32.mrf.mxu0 }
 0x13f   : > { %v462_v48 = vadd.f32 %v1262_v42, %v461_v47  ;;  %v524_v49 = vmax.f32 %v470_v45, 0.0 }
 0x140   : > { %v1343_v50 = vpop.f32.mrf.mxu0 }
 0x141   : > { %v522_v52 = vmax.f32 %v462_v48, 0.0  ;;  %v483_v54 = vadd.f32 %v1343_v50, %v1262_v42  ;;  %v538_v58 = vpack.c.bf16 %v524_v49, %v523_v53  ;;  %v1950_v50 = vld [vmem:[%s2408_s4] ss:$0 sm:$0xff] }
 0x142   : > { %v474_v55 = vpop.f32.mrf.mxu0 }
 0x143   : > { %v475_v56 = vadd.f32 %v1262_v42, %v474_v55  ;;  %v537_v57 = vpack.c.bf16 %v522_v52, %v521_v51  ;;  %v527_v61 = vmax.f32 %v483_v54, 0.0 }
 0x144   : > { %v1344_v59 = vpop.f32.mrf.mxu0 }
 0x145   : > { %v486_v60 = vadd.f32 %v1344_v59, %v1262_v42  ;;  %1369 = vmatprep.mubr.bf16.mxu1 %v537_v57  ;;  %v525_v63 = vmax.f32 %v475_v56, 0.0 }
 0x146   : > { %v477_v62 = vpop.f32.mrf.mxu0  ;;  %1370 = vmatmul.mubr.bf16.vlgmr.msra.gmra.mxu1 %v538_v58 }
 0x147   : > { %v528_v0 = vmax.f32 %v486_v60, 0.0  ;;  %v478_v1 = vadd.f32 %v1262_v42, %v477_v62 }
 0x148   : > { %v1347_v2 = vpop.f32.mrf.mxu0 }
 0x149   : > { %v526_v3 = vmax.f32 %v478_v1, 0.0  ;;  %v540_v6 = vpack.c.bf16 %v528_v0, %v527_v61  ;;  %v499_v7 = vadd.f32 %v1347_v2, %v1262_v42 }
 0x14a   : > { %v490_v8 = vpop.f32.mrf.mxu0 }
 0x14b   : > { %v539_v9 = vpack.c.bf16 %v526_v3, %v525_v63  ;;  %v491_v10 = vadd.f32 %v1262_v42, %v490_v8  ;;  %v531_v13 = vmax.f32 %v499_v7, 0.0 }
 0x14c   : > { %v1348_v11 = vpop.f32.mrf.mxu0 }
 0x14d   : > { %v502_v12 = vadd.f32 %v1348_v11, %v1262_v42  ;;  %1373 = vmatprep.mubr.bf16.mxu1 %v539_v9  ;;  %v529_v15 = vmax.f32 %v491_v10, 0.0 }
 0x14e   : > { %1374 = vmatmul.mubr.bf16.gmra.mxu1 %v540_v6  ;;  %v493_v14 = vpop.f32.mrf.mxu0 }
 0x14f   : > { %v532_v20 = vmax.f32 %v502_v12, 0.0  ;;  %v494_v21 = vadd.f32 %v1262_v42, %v493_v14 }
 0x150   : > { %v1351_v26 = vpop.f32.mrf.mxu0 }
 0x151   : > { %v530_v27 = vmax.f32 %v494_v21, 0.0  ;;  %v542_v32 = vpack.c.bf16 %v532_v20, %v531_v13  ;;  %v515_v33 = vadd.f32 %v1351_v26, %v1262_v42 }
 0x152   : > { %v506_v36 = vpop.f32.mrf.mxu0 }
 0x153   : > { %v541_v37 = vpack.c.bf16 %v530_v27, %v529_v15  ;;  %v507_v38 = vadd.f32 %v1262_v42, %v506_v36  ;;  %v535_v41 = vmax.f32 %v515_v33, 0.0 }
 0x154   : > { %v1352_v39 = vpop.f32.mrf.mxu0 }
 0x155   : > { %1377 = vmatprep.mubr.bf16.mxu1 %v541_v37  ;;  %v518_v40 = vadd.f32 %v1352_v39, %v1262_v42  ;;  %v533_v44 = vmax.f32 %v507_v38, 0.0 }
 0x156   : > { %1378 = vmatmul.mubr.bf16.gmra.mxu1 %v542_v32  ;;  %v509_v43 = vpop.f32.mrf.mxu0 }
 0x157   : > { %v536_v45 = vmax.f32 %v518_v40, 0.0  ;;  %v510_v46 = vadd.f32 %v1262_v42, %v509_v43 }
 0x159   : > { %v534_v47 = vmax.f32 %v510_v46, 0.0  ;;  %v544_v48 = vpack.c.bf16 %v536_v45, %v535_v41 }
 0x15b   : > { %v543_v49 = vpack.c.bf16 %v534_v47, %v533_v44 }
 0x15d   : > { %1381 = vmatprep.mubr.bf16.mxu1 %v543_v49 }
 0x15e   : > { %1382 = vmatmul.mubr.bf16.gmra.mxu1 %v544_v48 }
 0x206   : > { %v1371_v51 = vpop.f32.mrf.mxu1 }
 0x207   : > { %v659_v52 = vadd.f32 %v1371_v51, %v1950_v50 }
 0x208   : > { %v650_v53 = vpop.f32.mrf.mxu1 }
 0x209   : > { %v1954_v54 = vadd.f32 %v659_v52, %v1889_v16  ;;  %v651_v55 = vadd.f32 %v1950_v50, %v650_v53 }
 0x20a   : > { %v1372_v42 = vpop.f32.mrf.mxu1 }
 0x20b   : > { %v1958_v56 = vadd.f32 %v651_v55, %v1881_v4  ;;  %v662_v57 = vadd.f32 %v1372_v42, %v1950_v50  ;;  %733 = vadd.xlane.f32.xlu1 %v1954_v54  ;;  %v763_v61 = vmul.f32 %v1954_v54, %v1954_v54 }
 0x20c   : > { %v653_v58 = vpop.f32.mrf.mxu1 }
 0x20d   : > { %v1963_v59 = vadd.f32 %v662_v57, %v1892_v17  ;;  %v654_v60 = vadd.f32 %v1950_v50, %v653_v58  ;;  %729 = vadd.xlane.f32.xlu0 %v1958_v56  ;;  %v761_v0 = vmul.f32 %v1958_v56, %v1958_v56 }
 0x20e   : > { %v1375_v16 = vpop.f32.mrf.mxu1 }
 0x20f   : > { %735 = vadd.xlane.f32.xlu1 %v1963_v59  ;;  %v1971_v62 = vadd.f32 %v654_v60, %v1884_v5  ;;  %v764_v63 = vmul.f32 %v1963_v59, %v1963_v59  ;;  %v675_v6 = vadd.f32 %v1375_v16, %v1950_v50 }
 0x210   : > { %v666_v4 = vpop.f32.mrf.mxu1 }
 0x211   : > { %781 = vadd.xlane.f32.xlu0 %v763_v61  ;;  %v762_v2 = vmul.f32 %v1971_v62, %v1971_v62  ;;  %v1987_v9 = vadd.f32 %v675_v6, %v1905_v22  ;;  %v667_v10 = vadd.f32 %v1950_v50, %v666_v4 }
 0x212   : > { %v1376_v17 = vpop.f32.mrf.mxu1 }
 0x213   : > { %783 = vadd.xlane.f32.xlu1 %v764_v63  ;;  %v678_v1 = vadd.f32 %v1376_v17, %v1950_v50  ;;  %v767_v14 = vmul.f32 %v1987_v9, %v1987_v9 }
 0x214   : > { %v669_v3 = vpop.f32.mrf.mxu1 }
 0x215   : > { %777 = vadd.xlane.f32.xlu0 %v761_v0  ;;  %v1982_v5 = vadd.f32 %v678_v1, %v1908_v23  ;;  %v670_v7 = vadd.f32 %v1950_v50, %v669_v3  ;;  %v1996_v23 = vadd.f32 %v667_v10, %v1895_v18 }
 0x216   : > { %v1379_v8 = vpop.f32.mrf.mxu1 }
 0x217   : > { %779 = vadd.xlane.f32.xlu1 %v762_v2  ;;  %v1992_v11 = vadd.f32 %v670_v7, %v1898_v19  ;;  %v768_v22 = vmul.f32 %v1982_v5, %v1982_v5  ;;  %v691_v20 = vadd.f32 %v1379_v8, %v1950_v50  ;;  %v765_v21 = vmul.f32 %v1996_v23, %v1996_v23 }
 0x218   : > { %v682_v12 = vpop.f32.mrf.mxu1 }
 0x219   : > { %731 = vadd.xlane.f32.xlu0 %v1971_v62  ;;  %v766_v15 = vmul.f32 %v1992_v11, %v1992_v11  ;;  %v2015_v33 = vadd.f32 %v691_v20, %v1921_v28  ;;  %v683_v36 = vadd.f32 %v1950_v50, %v682_v12 }
 0x21a   : > { %v1380_v13 = vpop.f32.mrf.mxu1 }
 0x21b   : > { %743 = vadd.xlane.f32.xlu1 %v1982_v5  ;;  %v694_v19 = vadd.f32 %v1380_v13, %v1950_v50  ;;  %v771_v40 = vmul.f32 %v2015_v33, %v2015_v33 }
 0x21c   : > { %v685_v18 = vpop.f32.mrf.mxu1 }
 0x21d   : > { %741 = vadd.xlane.f32.xlu0 %v1987_v9  ;;  %v2011_v26 = vadd.f32 %v694_v19, %v1924_v29  ;;  %v686_v27 = vadd.f32 %v1950_v50, %v685_v18  ;;  %v2024_v29 = vadd.f32 %v683_v36, %v1911_v24 }
 0x21e   : > { %v1383_v32 = vpop.f32.mrf.mxu1 }
 0x21f   : > { %739 = vadd.xlane.f32.xlu1 %v1992_v11  ;;  %v2020_v37 = vadd.f32 %v686_v27, %v1914_v25  ;;  %v772_v28 = vmul.f32 %v2011_v26, %v2011_v26  ;;  %v707_v43 = vadd.f32 %v1383_v32, %v1950_v50  ;;  %v769_v44 = vmul.f32 %v2024_v29, %v2024_v29 }
 0x220   : > { %v698_v38 = vpop.f32.mrf.mxu1 }
 0x221   : > { %737 = vadd.xlane.f32.xlu0 %v1996_v23  ;;  %v770_v41 = vmul.f32 %v2020_v37, %v2020_v37  ;;  %v2043_v47 = vadd.f32 %v707_v43, %v1937_v34  ;;  %v699_v48 = vadd.f32 %v1950_v50, %v698_v38 }
 0x222   : > { %v1384_v39 = vpop.f32.mrf.mxu1 }
 0x223   : > { %791 = vadd.xlane.f32.xlu1 %v768_v22  ;;  %v710_v25 = vadd.f32 %v1384_v39, %v1950_v50  ;;  %v2052_v51 = vadd.f32 %v699_v48, %v1927_v30  ;;  %v775_v30 = vmul.f32 %v2043_v47, %v2043_v47 }
 0x224   : > { %v701_v24 = vpop.f32.mrf.mxu1 }
 0x225   : > { %789 = vadd.xlane.f32.xlu0 %v767_v14  ;;  %v2039_v45 = vadd.f32 %v710_v25, %v1940_v35  ;;  %v702_v46 = vadd.f32 %v1950_v50, %v701_v24  ;;  %v773_v35 = vmul.f32 %v2052_v51, %v2052_v51 }
 0x227   : > { %787 = vadd.xlane.f32.xlu1 %v766_v15  ;;  %v2048_v49 = vadd.f32 %v702_v46, %v1930_v31  ;;  %v776_v31 = vmul.f32 %v2039_v45, %v2039_v45 }
 0x229   : > { %785 = vadd.xlane.f32.xlu0 %v765_v21  ;;  %v774_v34 = vmul.f32 %v2048_v49, %v2048_v49 }
 0x22b   : > { %751 = vadd.xlane.f32.xlu1 %v2011_v26 }
 0x22d   : > { %749 = vadd.xlane.f32.xlu0 %v2015_v33 }
 0x22f   : > { %747 = vadd.xlane.f32.xlu1 %v2020_v37 }
 0x231   : > { %745 = vadd.xlane.f32.xlu0 %v2024_v29 }
 0x233   : > { %799 = vadd.xlane.f32.xlu1 %v772_v28 }
 0x235   : > { %797 = vadd.xlane.f32.xlu0 %v771_v40 }
 0x237   : > { %795 = vadd.xlane.f32.xlu1 %v770_v41 }
 0x239   : > { %793 = vadd.xlane.f32.xlu0 %v769_v44 }
 0x23b   : > { %759 = vadd.xlane.f32.xlu1 %v2039_v45 }
 0x23d   : > { %757 = vadd.xlane.f32.xlu0 %v2043_v47 }
 0x23f   : > { %755 = vadd.xlane.f32.xlu1 %v2048_v49 }
 0x241   : > { %753 = vadd.xlane.f32.xlu0 %v2052_v51 }
 0x243   : > { %803 = vadd.xlane.f32.xlu1 %v774_v34 }
 0x245   : > { %801 = vadd.xlane.f32.xlu0 %v773_v35 }
 0x247   : > { %807 = vadd.xlane.f32.xlu1 %v776_v31 }
 0x249   : > { %805 = vadd.xlane.f32.xlu0 %v775_v30 }
 0x294   : > { %v734_v50 = vpop.xlane.xlu1 %733 }
 0x295   : > { %v2064_v52 = vmul.f32 0.03125, %v734_v50 }
 0x296   : > { %v730_v53 = vpop.xlane.xlu0 %729 }
 0x297   : > { %v2066_v55 = vmul.f32 0.03125, %v730_v53  ;;  %v827_v42 = vmul.f32 32.0, %v2064_v52 }
 0x298   : > { %v736_v57 = vpop.xlane.xlu1 %735 }
 0x299   : > { %v2069_v58 = vmul.f32 0.03125, %v736_v57  ;;  %v843_v60 = vmul.f32 %v827_v42, %v2064_v52  ;;  %v825_v16 = vmul.f32 32.0, %v2066_v55 }
 0x29a   : > { %v782_v61 = vpop.xlane.xlu0 %781 }
 0x29b   : > { %v859_v4 = vsub.f32 %v782_v61, %v843_v60  ;;  %v828_v63 = vmul.f32 32.0, %v2069_v58  ;;  %v841_v2 = vmul.f32 %v825_v16, %v2066_v55 }
 0x29c   : > { %v784_v17 = vpop.xlane.xlu1 %783 }
 0x29d   : > { %v875_v0 = vmul.f32 0.032258064, %v859_v4  ;;  %v844_v1 = vmul.f32 %v828_v63, %v2069_v58 }
 0x29e   : > { %v778_v3 = vpop.xlane.xlu0 %777 }
 0x29f   : > { %v891_v6 = vmax.f32 %v875_v0, 0.0  ;;  %v860_v7 = vsub.f32 %v784_v17, %v844_v1  ;;  %v857_v8 = vsub.f32 %v778_v3, %v841_v2 }
 0x2a0   : > { %v780_v10 = vpop.xlane.xlu1 %779 }
 0x2a1   : > { %1474 = vrsqrt.f32 %v891_v6  ;;  %v876_v12 = vmul.f32 0.032258064, %v860_v7  ;;  %v873_v22 = vmul.f32 0.032258064, %v857_v8  ;;  %vm921_vm0 = vcmp.eq.f32.partialorder %v891_v6, inf }
 0x2a2   : > { %v732_v13 = vpop.xlane.xlu0 %731  ;;  %vm923_vm1 = vcmp.eq.f32.partialorder %v891_v6, 0.0  ;;  %v924_v61 = vand.u32 2147483648, %v891_v6 }
 0x2a3   : > { %v2076_v14 = vmul.f32 0.03125, %v732_v13  ;;  %v2078_v19 = vmax.f32 %v876_v12, 0.0  ;;  %v2080_v15 = vmax.f32 %v873_v22, 0.0 }
 0x2a4   : > { %v744_v18 = vpop.xlane.xlu1 %743 }
 0x2a5   : > { %v826_v20 = vmul.f32 32.0, %v2076_v14  ;;  %v2083_v21 = vmul.f32 0.03125, %v744_v18  ;;  %1476 = vrsqrt.f32 %v2078_v19  ;;  %vm928_vm2 = vcmp.eq.f32.partialorder %v2078_v19, inf }
 0x2a6   : > { %v742_v27 = vpop.xlane.xlu0 %741  ;;  %1478 = vrsqrt.f32 %v2080_v15  ;;  %vm930_vm3 = vcmp.eq.f32.partialorder %v2078_v19, 0.0  ;;  %vm907_vm4 = vcmp.eq.f32.partialorder %v2080_v15, inf  ;;  %vm909_vm5 = vcmp.eq.f32.partialorder %v2080_v15, 0.0 }
 0x2a7   : > { %v842_v32 = vmul.f32 %v826_v20, %v2076_v14  ;;  %v2088_v36 = vmul.f32 0.03125, %v742_v27  ;;  %v832_v28 = vmul.f32 32.0, %v2083_v21 }
 0x2a8   : > { %v740_v38 = vpop.xlane.xlu1 %739 }
 0x2a9   : > { %v2091_v39 = vmul.f32 0.03125, %v740_v38  ;;  %v858_v40 = vsub.f32 %v780_v10, %v842_v32  ;;  %v831_v41 = vmul.f32 32.0, %v2088_v36  ;;  %v848_v43 = vmul.f32 %v832_v28, %v2083_v21 }
 0x2aa   : > { %v738_v25 = vpop.xlane.xlu0 %737  ;;  %v910_v28 = vand.u32 2147483648, %v2080_v15 }
 0x2ab   : > { %v2094_v24 = vmul.f32 0.03125, %v738_v25  ;;  %v830_v44 = vmul.f32 32.0, %v2091_v39  ;;  %v874_v46 = vmul.f32 0.032258064, %v858_v40  ;;  %v847_v35 = vmul.f32 %v831_v41, %v2088_v36 }
 0x2ac   : > { %v792_v48 = vpop.xlane.xlu1 %791 }
 0x2ad   : > { %v864_v34 = vsub.f32 %v792_v48, %v848_v43  ;;  %v2099_v30 = vmax.f32 %v874_v46, 0.0  ;;  %v846_v53 = vmul.f32 %v830_v44, %v2091_v39  ;;  %v829_v16 = vmul.f32 32.0, %v2094_v24 }
 0x2ae   : > { %v1475_v31 = vpop.eup %1474  ;;  %v790_v50 = vpop.xlane.xlu0 %789 }
 0x2af   : > { %v920_v42 = vmul.f32 %v1475_v31, %v891_v6  ;;  %v880_v57 = vmul.f32 0.032258064, %v864_v34  ;;  %v863_v60 = vsub.f32 %v790_v50, %v847_v35  ;;  %1480 = vrsqrt.f32 %v2099_v30 }
 0x2b0   : > { %v788_v4 = vpop.xlane.xlu1 %787  ;;  %v845_v10 = vmul.f32 %v829_v16, %v2094_v24  ;;  %v1049_v16 = vsub.f32 %v1958_v56, %v2066_v55  ;;  %vm914_vm6 = vcmp.eq.f32.partialorder %v2099_v30, inf  ;;  %vm916_vm7 = vcmp.eq.f32.partialorder %v2099_v30, 0.0 }
 0x2b1   : > { %v922_v63 = vsel %vm921_vm0, %v891_v6, %v920_v42  ;;  %v2104_v17 = vmax.f32 %v880_v57, 0.0  ;;  %v879_v0 = vmul.f32 0.032258064, %v863_v60  ;;  %v862_v1 = vsub.f32 %v788_v4, %v846_v53 }
 0x2b2   : > { %v925_v2 = vsel %vm923_vm1, %v924_v61, %v922_v63  ;;  %v786_v3 = vpop.xlane.xlu0 %785  ;;  %v1477_v7 = vpop.eup %1476  ;;  %v931_v6 = vand.u32 2147483648, %v2078_v19  ;;  %v1051_v60 = vsub.f32 %v1954_v54, %v2064_v52  ;;  %v1052_v61 = vsub.f32 %v1963_v59, %v2069_v58 }
 0x2b3   : > { %v1019_v8 = vadd.f32 0.001, %v925_v2  ;;  %1482 = vrsqrt.f32 %v2104_v17  ;;  %v1479_v12 = vpop.eup %1478  ;;  %v927_v22 = vmul.f32 %v1477_v7, %v2078_v19  ;;  %v2112_v13 = vmax.f32 %v879_v0, 0.0 }
 0x2b4   : > { %v878_v18 = vmul.f32 0.032258064, %v862_v1  ;;  %v752_v20 = vpop.xlane.xlu1 %751  ;;  %v906_v27 = vmul.f32 %v1479_v12, %v2080_v15  ;;  %v861_v32 = vsub.f32 %v786_v3, %v845_v10  ;;  %v917_v0 = vand.u32 2147483648, %v2099_v30 }
 0x2b5   : > { %1484 = vrcp.f32 %v1019_v8  ;;  %v929_v38 = vsel %vm928_vm2, %v2078_v19, %v927_v22  ;;  %v2127_v44 = vmul.f32 0.03125, %v752_v20  ;;  %vm956_vm8 = vcmp.eq.f32.partialorder %v2104_v17, inf }
 0x2b6   : > { %1486 = vrsqrt.f32 %v2112_v13  ;;  %v750_v40 = vpop.xlane.xlu0 %749  ;;  %v932_v25 = vsel %vm930_vm3, %v931_v6, %v929_v38  ;;  %v908_v41 = vsel %vm907_vm4, %v2080_v15, %v906_v27  ;;  %v2125_v43 = vmax.f32 %v878_v18, 0.0  ;;  %v2168_v38 = vld [vmem:[%s2409_s5] ss:$0 sm:$0xff] }
 0x2b7   : > { %v1020_v46 = vadd.f32 0.001, %v932_v25  ;;  %v911_v48 = vsel %vm909_vm5, %v910_v28, %v908_v41  ;;  %v877_v34 = vmul.f32 0.032258064, %v861_v32  ;;  %v2132_v53 = vmul.f32 0.03125, %v750_v40 }
 0x2b8   : > { %v748_v35 = vpop.xlane.xlu1 %747  ;;  %v1017_v31 = vadd.f32 0.001, %v911_v48  ;;  %1488 = vrsqrt.f32 %v2125_v43  ;;  %v836_v57 = vmul.f32 32.0, %v2127_v44  ;;  %vm958_vm9 = vcmp.eq.f32.partialorder %v2104_v17, 0.0 }
 0x2b9   : > { %1490 = vrcp.f32 %v1020_v46  ;;  %v2130_v50 = vmax.f32 %v877_v34, 0.0  ;;  %v2134_v42 = vmul.f32 0.03125, %v748_v35  ;;  %v835_v52 = vmul.f32 32.0, %v2132_v53 }
 0x2ba   : > { %v746_v19 = vpop.xlane.xlu0 %745  ;;  %1492 = vrcp.f32 %v1017_v31  ;;  %v852_v1 = vmul.f32 %v836_v57, %v2127_v44  ;;  %v959_v58 = vand.u32 2147483648, %v2104_v17  ;;  %vm949_vm10 = vcmp.eq.f32.partialorder %v2112_v13, inf  ;;  %v2181_v31 = vld [vmem:[%s2410_s6] ss:$0 sm:$0xff] }
 0x2bb   : > { %v2136_v15 = vmul.f32 0.03125, %v746_v19  ;;  %1494 = vrsqrt.f32 %v2130_v50  ;;  %v834_v59 = vmul.f32 32.0, %v2134_v42  ;;  %vm951_vm11 = vcmp.eq.f32.partialorder %v2112_v13, 0.0 }
 0x2bc   : > { %v800_v4 = vpop.xlane.xlu1 %799  ;;  %v1481_v63 = vpop.eup %1480  ;;  %v851_v12 = vmul.f32 %v835_v52, %v2132_v53  ;;  %v952_v20 = vand.u32 2147483648, %v2112_v13  ;;  %vm942_vm12 = vcmp.eq.f32.partialorder %v2125_v43, inf  ;;  %vm944_vm13 = vcmp.eq.f32.partialorder %v2125_v43, 0.0 }
 0x2bd   : > { %v913_v54 = vmul.f32 %v1481_v63, %v2099_v30  ;;  %v868_v3 = vsub.f32 %v800_v4, %v852_v1  ;;  %v833_v7 = vmul.f32 32.0, %v2136_v15  ;;  %v850_v25 = vmul.f32 %v834_v59, %v2134_v42 }
 0x2be   : > { %v798_v2 = vpop.xlane.xlu0 %797  ;;  %vm935_vm14 = vcmp.eq.f32.partialorder %v2130_v50, inf  ;;  %vm937_vm15 = vcmp.eq.f32.partialorder %v2130_v50, 0.0 }
 0x2bf   : > { %v915_v10 = vsel %vm914_vm6, %v2099_v30, %v913_v54  ;;  %v884_v27 = vmul.f32 0.032258064, %v868_v3  ;;  %v867_v40 = vsub.f32 %v798_v2, %v851_v12  ;;  %v849_v35 = vmul.f32 %v833_v7, %v2136_v15 }
 0x2c0   : > { %v1483_v8 = vpop.eup %1482  ;;  %v796_v22 = vpop.xlane.xlu1 %795  ;;  %v918_v6 = vsel %vm916_vm7, %v917_v0, %v915_v10 }
 0x2c1   : > { %v955_v18 = vmul.f32 %v1483_v8, %v2104_v17  ;;  %v1018_v28 = vadd.f32 0.001, %v918_v6  ;;  %v2175_v34 = vmax.f32 %v884_v27, 0.0 }
 0x2c2   : > { %v1485_v32 = vpop.eup %1484  ;;  %v794_v41 = vpop.xlane.xlu0 %793 }
 0x2c3   : > { %v1487_v30 = vpop.eup %1486  ;;  %v1067_v46 = vmul.f32 %v1485_v32, %v1051_v60  ;;  %v957_v48 = vsel %vm956_vm8, %v2104_v17, %v955_v18  ;;  %1496 = vrcp.f32 %v1018_v28  ;;  %v883_v60 = vmul.f32 0.032258064, %v867_v40 }
 0x2c4   : > { %v960_v19 = vsel %vm958_vm9, %v959_v58, %v957_v48  ;;  %v948_v57 = vmul.f32 %v1487_v30, %v2112_v13  ;;  %v760_v4 = vpop.xlane.xlu1 %759  ;;  %1498 = vrsqrt.f32 %v2175_v34  ;;  %v866_v17 = vsub.f32 %v796_v22, %v850_v25 }
 0x2c5   : > { %v1090_v63 = vmul.f32 %v2168_v38, %v1067_v46  ;;  %v1024_v0 = vadd.f32 0.001, %v960_v19  ;;  %v1489_v1 = vpop.eup %1488  ;;  %v2192_v52 = vmax.f32 %v883_v60, 0.0  ;;  %v865_v2 = vsub.f32 %v794_v41, %v849_v35 }
 0x2c6   : > { %v950_v54 = vsel %vm949_vm10, %v2112_v13, %v948_v57  ;;  %v758_v59 = vpop.xlane.xlu0 %757  ;;  %v1491_v58 = vpop.eup %1490  ;;  %v941_v8 = vmul.f32 %v1489_v1, %v2125_v43  ;;  %v945_v18 = vand.u32 2147483648, %v2125_v43  ;;  %v2221_v46 = vmul.f32 0.03125, %v760_v4 }
 0x2c7   : > { %v1113_v3 = vadd.f32 %v2181_v31, %v1090_v63  ;;  %1500 = vrcp.f32 %v1024_v0  ;;  %v953_v7 = vsel %vm951_vm11, %v952_v20, %v950_v54  ;;  %v1493_v10 = vpop.eup %1492  ;;  %v1068_v12 = vmul.f32 %v1491_v58, %v1052_v61 }
 0x2c8   : > { %v1023_v6 = vadd.f32 0.001, %v953_v7  ;;  %1502 = vrsqrt.f32 %v2192_v52  ;;  %v756_v27 = vpop.xlane.xlu1 %755  ;;  %v1495_v22 = vpop.eup %1494  ;;  %v1065_v13 = vmul.f32 %v1493_v10, %v1049_v16  ;;  %v943_v61 = vsel %vm942_vm12, %v2125_v43, %v941_v8 }
 0x2c9   : > { %1129 = vst [vmem:[%s2202_s10 + $0x10] sm:$0xff] %v1113_v3  ;;  %v938_v20 = vand.u32 2147483648, %v2130_v50  ;;  %v1091_v32 = vmul.f32 %v2168_v38, %v1068_v12  ;;  %v946_v28 = vsel %vm944_vm13, %v945_v18, %v943_v61  ;;  %v934_v40 = vmul.f32 %v1495_v22, %v2130_v50 }
 0x2ca   : > { %1504 = vrcp.f32 %v1023_v6  ;;  %v1088_v56 = vmul.f32 %v2168_v38, %v1065_v13  ;;  %v1022_v55 = vadd.f32 0.001, %v946_v28  ;;  %v882_v16 = vmul.f32 0.032258064, %v866_v17  ;;  %v754_v48 = vpop.xlane.xlu0 %753 }
 0x2cb   : > { %v881_v25 = vmul.f32 0.032258064, %v865_v2  ;;  %v1114_v41 = vadd.f32 %v2181_v31, %v1091_v32  ;;  %v936_v30 = vsel %vm935_vm14, %v2130_v50, %v934_v40  ;;  %v1050_v0 = vsub.f32 %v1971_v62, %v2076_v14 }
 0x2cc   : > { %v1111_v43 = vadd.f32 %v2181_v31, %v1088_v56  ;;  %1506 = vrcp.f32 %v1022_v55  ;;  %v939_v35 = vsel %vm937_vm15, %v938_v20, %v936_v30  ;;  %v2224_v19 = vmax.f32 %v882_v16, 0.0  ;;  %v804_v63 = vpop.xlane.xlu1 %803 }
 0x2cd   : > { %1130 = vst [vmem:[%s2202_s10 + $0x18] sm:$0xff] %v1114_v41  ;;  %v1021_v57 = vadd.f32 0.001, %v939_v35  ;;  %v2227_v60 = vmax.f32 %v881_v25, 0.0  ;;  %v1056_v50 = vsub.f32 %v1982_v5, %v2083_v21  ;;  %v1055_v4 = vsub.f32 %v1987_v9, %v2088_v36 }
 0x2ce   : > { %1127 = vst [vmem:[%s2202_s10] sm:$0xff] %v1111_v43  ;;  %1508 = vrsqrt.f32 %v2224_v19  ;;  %v1054_v1 = vsub.f32 %v1992_v11, %v2091_v39  ;;  %v2239_v54 = vmul.f32 0.03125, %v758_v59  ;;  %v2242_v2 = vmul.f32 0.03125, %v756_v27  ;;  %v802_v11 = vpop.xlane.xlu0 %801 }
 0x2cf   : > { %1510 = vrcp.f32 %v1021_v57  ;;  %v2244_v62 = vmul.f32 0.03125, %v754_v48  ;;  %v840_v5 = vmul.f32 32.0, %v2221_v46  ;;  %vm984_vm0 = vcmp.eq.f32.partialorder %v2175_v34, inf }
 0x2d0   : > { %v1497_v17 = vpop.eup %1496  ;;  %1512 = vrsqrt.f32 %v2227_v60  ;;  %vm986_vm1 = vcmp.eq.f32.partialorder %v2175_v34, 0.0  ;;  %v987_v9 = vand.u32 2147483648, %v2175_v34  ;;  %vm977_vm2 = vcmp.eq.f32.partialorder %v2192_v52, inf  ;;  %v808_v8 = vpop.xlane.xlu1 %807 }
 0x2d1   : > { %v1499_v14 = vpop.eup %1498  ;;  %v1066_v21 = vmul.f32 %v1497_v17, %v1050_v0  ;;  %vm979_vm3 = vcmp.eq.f32.partialorder %v2192_v52, 0.0  ;;  %v838_v39 = vmul.f32 32.0, %v2242_v2  ;;  %v980_v3 = vand.u32 2147483648, %v2192_v52 }
 0x2d2   : > { %v983_v36 = vmul.f32 %v1499_v14, %v2175_v34  ;;  %v837_v7 = vmul.f32 32.0, %v2244_v62  ;;  %v839_v10 = vmul.f32 32.0, %v2239_v54  ;;  %v856_v22 = vmul.f32 %v840_v5, %v2221_v46  ;;  %v806_v48 = vpop.xlane.xlu0 %805 }
 0x2d3   : > { %v1089_v58 = vmul.f32 %v2168_v38, %v1066_v21  ;;  %v854_v27 = vmul.f32 %v838_v39, %v2242_v2  ;;  %v1053_v5 = vsub.f32 %v1996_v23, %v2094_v24  ;;  %vm970_vm4 = vcmp.eq.f32.partialorder %v2224_v19, inf }
 0x2d4   : > { %v1501_v59 = vpop.eup %1500  ;;  %v985_v18 = vsel %vm984_vm0, %v2175_v34, %v983_v36  ;;  %v853_v32 = vmul.f32 %v837_v7, %v2244_v62  ;;  %v872_v16 = vsub.f32 %v808_v8, %v856_v22  ;;  %v855_v34 = vmul.f32 %v839_v10, %v2239_v54 }
 0x2d5   : > { %v1503_v12 = vpop.eup %1502  ;;  %v1072_v6 = vmul.f32 %v1501_v59, %v1056_v50  ;;  %v1112_v13 = vadd.f32 %v2181_v31, %v1089_v58  ;;  %v988_v61 = vsel %vm986_vm1, %v987_v9, %v985_v18  ;;  %v870_v55 = vsub.f32 %v804_v63, %v854_v27 }
 0x2d6   : > { %v976_v20 = vmul.f32 %v1503_v12, %v2192_v52  ;;  %v1028_v56 = vadd.f32 0.001, %v988_v61  ;;  %v869_v30 = vsub.f32 %v802_v11, %v853_v32  ;;  %v888_v17 = vmul.f32 0.032258064, %v872_v16 }
 0x2d7   : > { %v1505_v28 = vpop.eup %1504  ;;  %v1095_v40 = vmul.f32 %v2168_v38, %v1072_v6  ;;  %1128 = vst [vmem:[%s2202_s10 + $0x8] sm:$0xff] %v1112_v13  ;;  %v886_v57 = vmul.f32 0.032258064, %v870_v55  ;;  %v871_v9 = vsub.f32 %v806_v48, %v855_v34  ;;  %vm972_vm5 = vcmp.eq.f32.partialorder %v2224_v19, 0.0 }
 0x2d8   : > { %v1071_v25 = vmul.f32 %v1505_v28, %v1055_v4  ;;  %v978_v41 = vsel %vm977_vm2, %v2192_v52, %v976_v20  ;;  %1514 = vrcp.f32 %v1028_v56  ;;  %v885_v4 = vmul.f32 0.032258064, %v869_v30 }
 0x2d9   : > { %v1118_v43 = vadd.f32 %v2181_v31, %v1095_v40  ;;  %v981_v35 = vsel %vm979_vm3, %v980_v3, %v978_v41  ;;  %v1507_v63 = vpop.eup %1506  ;;  %v2281_v21 = vmax.f32 %v886_v57, 0.0  ;;  %v2288_v23 = vmax.f32 %v888_v17, 0.0 }
 0x2da   : > { %v1094_v0 = vmul.f32 %v2168_v38, %v1071_v25  ;;  %v1027_v50 = vadd.f32 0.001, %v981_v35  ;;  %v1070_v14 = vmul.f32 %v1507_v63, %v1054_v1  ;;  %v901_v36 = vmax.f32 %v885_v4, 0.0 }
 0x2db   : > { %1134 = vst [vmem:[%s2202_s10 + $0x38] sm:$0xff] %v1118_v43  ;;  %v1509_v11 = vpop.eup %1508  ;;  %v973_v3 = vand.u32 2147483648, %v2224_v19  ;;  %v887_v12 = vmul.f32 0.032258064, %v871_v9  ;;  %vm963_vm6 = vcmp.eq.f32.partialorder %v2227_v60, inf  ;;  %v966_v27 = vand.u32 2147483648, %v2227_v60 }
 0x2dc   : > { %v1117_v52 = vadd.f32 %v2181_v31, %v1094_v0  ;;  %1516 = vrcp.f32 %v1027_v50  ;;  %v1511_v39 = vpop.eup %1510  ;;  %v1093_v59 = vmul.f32 %v2168_v38, %v1070_v14  ;;  %v969_v58 = vmul.f32 %v1509_v11, %v2224_v19 }
 0x2dd   : > { %1518 = vrsqrt.f32 %v2281_v21  ;;  %v1513_v24 = vpop.eup %1512  ;;  %v1069_v1 = vmul.f32 %v1511_v39, %v1053_v5  ;;  %vm965_vm7 = vcmp.eq.f32.partialorder %v2227_v60, 0.0  ;;  %v903_v32 = vmax.f32 %v887_v12, 0.0 }
 0x2de   : > { %1133 = vst [vmem:[%s2202_s10 + $0x30] sm:$0xff] %v1117_v52  ;;  %1520 = vrsqrt.f32 %v901_v36  ;;  %v1116_v7 = vadd.f32 %v2181_v31, %v1093_v59  ;;  %v971_v8 = vsel %vm970_vm4, %v2224_v19, %v969_v58  ;;  %v962_v10 = vmul.f32 %v1513_v24, %v2227_v60 }
 0x2df   : > { %v1092_v6 = vmul.f32 %v2168_v38, %v1069_v1  ;;  %v974_v18 = vsel %vm972_vm5, %v973_v3, %v971_v8  ;;  %1522 = vrsqrt.f32 %v2288_v23  ;;  %v1060_v28 = vsub.f32 %v2011_v26, %v2127_v44 }
 0x2e0   : > { %1132 = vst [vmem:[%s2202_s10 + $0x28] sm:$0xff] %v1116_v7  ;;  %v1026_v22 = vadd.f32 0.001, %v974_v18  ;;  %v964_v13 = vsel %vm963_vm6, %v2227_v60, %v962_v10  ;;  %v1059_v60 = vsub.f32 %v2015_v33, %v2132_v53  ;;  %vm998_vm8 = vcmp.eq.f32.partialorder %v2281_v21, inf }
 0x2e1   : > { %v1115_v19 = vadd.f32 %v2181_v31, %v1092_v6  ;;  %v967_v61 = vsel %vm965_vm7, %v966_v27, %v964_v13  ;;  %v1001_v44 = vand.u32 2147483648, %v2281_v21  ;;  %vm1000_vm9 = vcmp.eq.f32.partialorder %v2281_v21, 0.0 }
 0x2e2   : > { %1524 = vrcp.f32 %v1026_v22  ;;  %v1025_v20 = vadd.f32 0.001, %v967_v61  ;;  %vm991_vm10 = vcmp.eq.f32.partialorder %v901_v36, inf  ;;  %v994_v53 = vand.u32 2147483648, %v901_v36 }
 0x2e3   : > { %1131 = vst [vmem:[%s2202_s10 + $0x20] sm:$0xff] %v1115_v19  ;;  %vm993_vm11 = vcmp.eq.f32.partialorder %v901_v36, 0.0  ;;  %v1058_v50 = vsub.f32 %v2020_v37, %v2134_v42  ;;  %v1057_v9 = vsub.f32 %v2024_v29, %v2136_v15  ;;  %vm1012_vm12 = vcmp.eq.f32.partialorder %v2288_v23, inf }
 0x2e4   : > { %1526 = vrcp.f32 %v1025_v20  ;;  %v1015_v11 = vand.u32 2147483648, %v2288_v23  ;;  %vm1014_vm13 = vcmp.eq.f32.partialorder %v2288_v23, 0.0  ;;  %vm1005_vm14 = vcmp.eq.f32.partialorder %v903_v32, inf }
 0x2e5   : > { %v1515_v40 = vpop.eup %1514  ;;  %1528 = vrsqrt.f32 %v903_v32  ;;  %v1008_v3 = vand.u32 2147483648, %v903_v32  ;;  %vm1007_vm15 = vcmp.eq.f32.partialorder %v903_v32, 0.0  ;;  %v1062_v12 = vsub.f32 %v2048_v49, %v2242_v2 }
 0x2e6   : > { %v1076_v56 = vmul.f32 %v1515_v40, %v1060_v28  ;;  %v1061_v18 = vsub.f32 %v2052_v51, %v2244_v62  ;;  %v1064_v19 = vsub.f32 %v2039_v45, %v2221_v46  ;;  %v1063_v28 = vsub.f32 %v2043_v47, %v2239_v54 }
 0x2e8   : > { %v1099_v16 = vmul.f32 %v2168_v38, %v1076_v56 }
 0x2e9   : > { %v1517_v55 = vpop.eup %1516 }
 0x2ea   : > { %v1519_v25 = vpop.eup %1518  ;;  %v1075_v41 = vmul.f32 %v1517_v55, %v1059_v60  ;;  %v1122_v34 = vadd.f32 %v2181_v31, %v1099_v16 }
 0x2eb   : > { %v1521_v30 = vpop.eup %1520  ;;  %v997_v48 = vmul.f32 %v1519_v25, %v2281_v21 }
 0x2ec   : > { %v1098_v26 = vmul.f32 %v2168_v38, %v1075_v41  ;;  %v990_v43 = vmul.f32 %v1521_v30, %v901_v36  ;;  %1138 = vst [vmem:[%s2202_s10 + $0x58] sm:$0xff] %v1122_v34  ;;  %v1523_v35 = vpop.eup %1522 }
 0x2ed   : > { %v999_v33 = vsel %vm998_vm8, %v2281_v21, %v997_v48  ;;  %v1011_v5 = vmul.f32 %v1523_v35, %v2288_v23 }
 0x2ee   : > { %v1121_v57 = vadd.f32 %v2181_v31, %v1098_v26  ;;  %v1002_v63 = vsel %vm1000_vm9, %v1001_v44, %v999_v33  ;;  %v992_v0 = vsel %vm991_vm10, %v901_v36, %v990_v43 }
 0x2ef   : > { %v1030_v4 = vadd.f32 0.001, %v1002_v63  ;;  %v995_v17 = vsel %vm993_vm11, %v994_v53, %v992_v0  ;;  %v1525_v14 = vpop.eup %1524  ;;  %v1013_v36 = vsel %vm1012_vm12, %v2288_v23, %v1011_v5 }
 0x2f0   : > { %1137 = vst [vmem:[%s2202_s10 + $0x50] sm:$0xff] %v1121_v57  ;;  %v1029_v21 = vadd.f32 0.001, %v995_v17  ;;  %v1074_v52 = vmul.f32 %v1525_v14, %v1058_v50  ;;  %v1016_v42 = vsel %vm1014_vm13, %v1015_v11, %v1013_v36 }
 0x2f1   : > { %1530 = vrcp.f32 %v1030_v4  ;;  %v1527_v37 = vpop.eup %1526  ;;  %v1032_v59 = vadd.f32 0.001, %v1016_v42 }
 0x2f2   : > { %1532 = vrcp.f32 %v1029_v21  ;;  %v1529_v39 = vpop.eup %1528  ;;  %v1097_v29 = vmul.f32 %v2168_v38, %v1074_v52  ;;  %v1073_v15 = vmul.f32 %v1527_v37, %v1057_v9 }
 0x2f3   : > { %v1004_v58 = vmul.f32 %v1529_v39, %v903_v32  ;;  %1534 = vrcp.f32 %v1032_v59 }
 0x2f4   : > { %v1120_v24 = vadd.f32 %v2181_v31, %v1097_v29  ;;  %v1096_v1 = vmul.f32 %v2168_v38, %v1073_v15 }
 0x2f5   : > { %v1006_v7 = vsel %vm1005_vm14, %v903_v32, %v1004_v58 }
 0x2f6   : > { %1136 = vst [vmem:[%s2202_s10 + $0x48] sm:$0xff] %v1120_v24  ;;  %v1119_v23 = vadd.f32 %v2181_v31, %v1096_v1  ;;  %v1009_v8 = vsel %vm1007_vm15, %v1008_v3, %v1006_v7 }
 0x2f7   : > { %v1031_v10 = vadd.f32 0.001, %v1009_v8 }
 0x2f8   : > { %1135 = vst [vmem:[%s2202_s10 + $0x40] sm:$0xff] %v1119_v23 }
 0x2f9   : > { %1536 = vrcp.f32 %v1031_v10 }
 0x2fe   : > { %v1531_v6 = vpop.eup %1530 }
 0x2ff   : > { %v1533_v27 = vpop.eup %1532  ;;  %v1078_v22 = vmul.f32 %v1531_v6, %v1062_v12 }
 0x300   : > { %v1077_v13 = vmul.f32 %v1533_v27, %v1061_v18  ;;  %v1535_v20 = vpop.eup %1534 }
 0x301   : > { %v1101_v61 = vmul.f32 %v2168_v38, %v1078_v22  ;;  %v1080_v2 = vmul.f32 %v1535_v20, %v1064_v19 }
 0x302   : > { %v1100_v32 = vmul.f32 %v2168_v38, %v1077_v13 }
 0x303   : > { %v1124_v49 = vadd.f32 %v2181_v31, %v1101_v61  ;;  %v1103_v62 = vmul.f32 %v2168_v38, %v1080_v2 }
 0x304   : > { %v1123_v51 = vadd.f32 %v2181_v31, %v1100_v32 }
 0x305   : > { %1140 = vst [vmem:[%s2202_s10 + $0x68] sm:$0xff] %v1124_v49  ;;  %v1126_v46 = vadd.f32 %v2181_v31, %v1103_v62 }
 0x306   : > { %1139 = vst [vmem:[%s2202_s10 + $0x60] sm:$0xff] %v1123_v51  ;;  %v1537_v45 = vpop.eup %1536 }
 0x307   : > { %v1079_v40 = vmul.f32 %v1537_v45, %v1063_v28  ;;  %1142 = vst [vmem:[%s2202_s10 + $0x78] sm:$0xff] %v1126_v46 }
 0x309   : > { %v1102_v56 = vmul.f32 %v2168_v38, %v1079_v40 }
 0x30b   : > { %v1125_v47 = vadd.f32 %v2181_v31, %v1102_v56 }
 0x30d   : > { %1141 = vst [vmem:[%s2202_s10 + $0x70] sm:$0xff] %v1125_v47 }
 0x30e   : > { %1631 = shalt.err (!%p1628_p9)
}
 0x30f   : > { %s1632_s21 = scalar_lea.hbm %s2358_s17, 2048  ;;  %s1636_s19 = scalar_lea.hbm %s2411_s7, 6144 }
 0x310   : > { %p1633_p12 = scmp.ne.s32.totalorder %s2358_s17, %s1632_s21  ;;  %p1637_p4 = scmp.lt.s32.totalorder %s2358_s17, %s2411_s7 }
 0x311   : > { %p1638_p8 = scmp.lt.s32.totalorder %s1636_s19, %s1632_s21 }
 0x312   : > { %p1634_p3 = pnand %p1633_p12, %p2429_p0 }
 0x313   : > { %p1639_p5 = por %p1638_p8, %p1637_p4 }
 0x314   : > { %p1635_p13 = pneg %p1634_p3 }
 0x316   : > { %p1640_p10 = pnand %p1639_p5, %p1635_p13 }
 0x318   : > { %1643 = shalt.err (!%p1640_p10)
}
 0x319   : > { %s1696_s1 = smov 128   ;;  %s1697_s16 = smov 8  }
 0x31a   : > { %1395 = dma.vmem_to_hbm [thread:$0]  (%p2429_p0), %s2360_s14, 2048, %s2358_s17, %s1144_s30, %s1696_s1, %s1696_s1, %s1697_s16  }
 0x31b PF: > { %p1417_p1 = scmp.ge.s32.totalorder %s1686_s27, 2  ;;  %s1172_s9 = sand.u32 1, %s1674_s24  }
 0x31c   : > { %p2430_p2 = scmp.ne.s32.totalorder %s2418_s8, 0  ;;  %s1173_s28 = scalar_lea.sflag [#allocation4], %s1172_s9 }
 0x31e   : > { %p1409_p6 = pnand %p1417_p1, %p2430_p2 }
 0x320   : > { %p1410_p11 = pneg %p1409_p6 }
 0x322   : > { %1669 = dma.done.wait (%p1410_p11), %s1173_s28, 2048  }
 0x323   : > { %1671 = vsyncadd (%p1410_p11), %s1173_s28, 4294965248  ;;  %p21_p7 = scmp.ge.s32.totalorder %s1809_s23, 5   ;;  %s2431_s24 = smov %s1678_s25 }
 0x324   : > { %s2432_s25 = smov %s1682_s26  ;;  %s2433_s26 = smov %s1825_s12 }
 0x325   : > { %s2434_s27 = smov %s1809_s23  ;;  %23 = sbr.rel (!%p21_p7) target bundleno = 8 (0x8), region = 101 }
 0x32a   :  { %1178 = vsyncpa [#allocation3], 1 }
 0x32b   :  { %1180 = vsyncpa [#allocation3 + $0x1], 1 }
 0x32c   :  { %1181 = vsyncpa [#allocation6], 1 }
 0x32d   :  { %1182 = vsyncpa [#allocation4], 1 }
 0x32e   :  { %1184 = vsyncpa [#allocation4 + $0x1], 1 }

</bundles_post_ra>
